<compile_context>
chip_gen: v7x
topology: tpu7x:2x2x1
jax: 0.10.0
libtpu: 0.0.40
codegen_flags: <defaults>
</compile_context>

<pallas_src>
import functools
import math

import jax
import jax.numpy as jnp
from jax import lax
from jax.experimental import pallas as pl
from jax.experimental.pallas import tpu as pltpu


def _round_up(n, m):
    return -(-n // m) * m


# ---------------------------------------------------------------------------
# Path 1: small table resident in VMEM, one-hot MXU gather.
# ---------------------------------------------------------------------------
def _onehot_embed_kernel(ids_ref, table_ref, out_ref, *, scale):
    # ids_ref:   (tile_n, 1) int32 (VMEM)
    # table_ref: (V, D)      table, resident (same block every step)
    # out_ref:   (tile_n, D)
    ids = ids_ref[...]
    tile_n = ids.shape[0]
    vocab = table_ref.shape[0]
    iota = lax.broadcasted_iota(jnp.int32, (tile_n, vocab), 1)
    onehot = (ids == iota).astype(table_ref.dtype)            # (tile_n, V)
    acc = jnp.dot(onehot, table_ref[...], preferred_element_type=jnp.float32)
    out_ref[...] = (acc * scale).astype(out_ref.dtype)


def _embed_resident(ids, table, *, tile_n, scale, vmem_limit):
    (n_pad,) = ids.shape
    V, D = table.shape
    n_tiles = n_pad // tile_n
    kernel = functools.partial(_onehot_embed_kernel, scale=scale)
    return pl.pallas_call(
        kernel,
        out_shape=jax.ShapeDtypeStruct((n_pad, D), table.dtype),
        grid=(n_tiles,),
        in_specs=[
            pl.BlockSpec((tile_n, 1), lambda i: (i, 0)),       # ids tile
            pl.BlockSpec((V, D), lambda i: (0, 0)),            # table resident
        ],
        out_specs=pl.BlockSpec((tile_n, D), lambda i: (i, 0)),
        compiler_params=pltpu.CompilerParams(
            dimension_semantics=("parallel",),
            vmem_limit_bytes=vmem_limit),
    )(ids.reshape(n_pad, 1), table)


# ---------------------------------------------------------------------------
# Path 2: large table in HBM, manual double-buffered row-DMA gather.
# ---------------------------------------------------------------------------
def _hbm_gather_kernel(ids_ref, table_hbm, out_ref, buf, sems, *, tile_n, scale):
    # ids_ref:   (n_pad,)        int32 in SMEM (scalar prefetch)
    # table_hbm: (V, D)          raw HBM ref (no auto-DMA)
    # out_ref:   (tile_n, D)     output tile (VMEM, auto-pipelined)
    # buf:       (2, tile_n, D)  VMEM double buffer
    # sems:      (2,)            one shared DMA semaphore per slot
    i = pl.program_id(0)
    nsteps = pl.num_programs(0)
    slot = i % 2

    def issue_tile(tile_idx, dst_slot):
        # tile_n independent (1, D) row DMAs, all signalling sems[dst_slot].
        def body(r, carry):
            tok = ids_ref[tile_idx * tile_n + r]
            pltpu.make_async_copy(
                table_hbm.at[pl.ds(tok, 1), :],
                buf.at[dst_slot, pl.ds(r, 1), :],
                sems.at[dst_slot],
            ).start()
            return carry
        lax.fori_loop(0, tile_n, body, 0, unroll=8)

    # Prime the pipeline: step 0 fetches its own tile.
    @pl.when(i == 0)
    def _():
        issue_tile(0, 0)

    # Prefetch next tile into the other slot before waiting on the current
    # one (all scalar id reads happen before any .wait()).
    @pl.when(i + 1 < nsteps)
    def _():
        issue_tile(i + 1, 1 - slot)

    # Drain this slot: tile_n waits of one (1, D) row's worth on the shared
    # per-slot semaphore (the dummy descriptor only fixes the expected size).
    def wait_body(r, carry):
        pltpu.make_async_copy(
            table_hbm.at[pl.ds(0, 1), :],
            buf.at[slot, pl.ds(0, 1), :],
            sems.at[slot],
        ).wait()
        return carry
    lax.fori_loop(0, tile_n, wait_body, 0, unroll=8)

    out_ref[...] = (buf[slot].astype(jnp.float32) * scale).astype(out_ref.dtype)


def _embed_hbm_gather(ids, table, *, tile_n, scale, vmem_limit):
    (n_pad,) = ids.shape
    V, D = table.shape
    n_tiles = n_pad // tile_n
    kernel = functools.partial(_hbm_gather_kernel, tile_n=tile_n, scale=scale)
    return pl.pallas_call(
        kernel,
        out_shape=jax.ShapeDtypeStruct((n_pad, D), table.dtype),
        grid_spec=pltpu.PrefetchScalarGridSpec(
            num_scalar_prefetch=1,                      # ids -> SMEM
            grid=(n_tiles,),
            in_specs=[pl.BlockSpec(memory_space=pl.ANY)],   # table stays in HBM
            out_specs=pl.BlockSpec((tile_n, D), lambda i, ids: (i, 0)),
            scratch_shapes=[
                pltpu.VMEM((2, tile_n, D), table.dtype),    # double buffer
                pltpu.SemaphoreType.DMA((2,)),              # one sem per slot
            ],
        ),
        compiler_params=pltpu.CompilerParams(
            # Double-buffer state is carried across grid steps -> sequential.
            dimension_semantics=("arbitrary",),
            vmem_limit_bytes=vmem_limit),
    )(ids, table)


# ---------------------------------------------------------------------------
# Public wrapper (= InputEmbedding.forward).
# ---------------------------------------------------------------------------
def input_embedding(x, table, *, tile_n=None, force_hbm_gather=False):
    """x: int token ids (any shape); table: (vocab, d_model).

    Returns table[x] * sqrt(d_model), shape x.shape + (d_model,), dtype of table.
    """
    V, D = table.shape
    lead_shape = x.shape
    N = int(math.prod(lead_shape))
    itemsize = jnp.dtype(table.dtype).itemsize
    granule = max(8, 32 // itemsize)        # f32: 8 rows, bf16: 16, int8: 32
    scale = float(math.sqrt(D))

    # Pick the biggest tile that keeps scratch + output pipeline <= ~16 MiB
    # (safe on v5e's 16 MiB scoped default and v7x's 64 MiB physical VMEM).
    if tile_n is None:
        tile_n = 256
        while tile_n > granule and 4 * tile_n * D * itemsize > (16 << 20):
            tile_n //= 2
        tile_n = max(granule, (tile_n // granule) * granule)
    if tile_n % granule != 0 or tile_n < granule:
        raise ValueError(f"tile_n must be a multiple of {granule} for "
                         f"dtype {table.dtype}")

    # Clamp ids so padding / bad tokens never produce an OOB HBM DMA.
    ids = jnp.clip(x.reshape(N).astype(jnp.int32), 0, V - 1)

    table_bytes = V * D * itemsize
    use_resident = (not force_hbm_gather) and table_bytes <= (4 << 20) and V <= 1024

    if use_resident:
        tile = min(tile_n, max(granule, _round_up(N, granule)))
        n_pad = _round_up(N, tile)
        if n_pad != N:
            ids = jnp.pad(ids, (0, n_pad - N))
        vmem_limit = min(
            max(2 * table_bytes + 4 * tile * D * itemsize + (4 << 20), 32 << 20),
            64 << 20)
        out_flat = _embed_resident(ids, table, tile_n=tile, scale=scale,
                                   vmem_limit=vmem_limit)[:N]
    else:
        vmem_limit = min(max(8 * tile_n * D * itemsize, 32 << 20), 64 << 20)
        # Bound the SMEM footprint of the prefetched ids (1-D s32 pads to
        # next_pow2(4*N)) by chunking the call over the token axis.
        max_tokens = 1 << 16
        chunk = max(tile_n, (max_tokens // tile_n) * tile_n)
        pieces = []
        for start in range(0, N, chunk):
            part = ids[start:start + chunk]
            n_part = part.shape[0]
            n_pad = _round_up(n_part, tile_n)
            if n_pad != n_part:
                part = jnp.pad(part, (0, n_pad - n_part))
            out_part = _embed_hbm_gather(part, table, tile_n=tile_n,
                                         scale=scale, vmem_limit=vmem_limit)
            pieces.append(out_part[:n_part])
        out_flat = pieces[0] if len(pieces) == 1 else jnp.concatenate(pieces, 0)

    return out_flat.reshape(*lead_shape, D)


if __name__ == "__main__":
    # Small shapes consistent with the module; d_model=128 keeps output tiles
    # lane-dense.
    d_model = 128
    vocab_size = 64
    B, S = 2, 8

    key = jax.random.PRNGKey(0)
    k_ids, k_tab = jax.random.split(key)

    # Deterministic "parameters" (nn.Embedding weight ~ N(0,1)) and inputs.
    table = jax.random.normal(k_tab, (vocab_size, d_model), dtype=jnp.float32)
    x = jax.random.randint(k_ids, (B, S), 0, vocab_size, dtype=jnp.int32)

    ref = table[x] * math.sqrt(d_model)

    # Fast path: table resident in VMEM, one-hot MXU gather.
    out_fast = jax.block_until_ready(input_embedding(x, table))
    assert out_fast.shape == (B, S, d_model)
    assert jnp.allclose(out_fast, ref, atol=1e-5, rtol=1e-5), "fast path mismatch"

    # Large-table path: scalar-prefetched ids + double-buffered HBM row DMAs.
    out_gather = jax.block_until_ready(
        input_embedding(x, table, force_hbm_gather=True))
    assert out_gather.shape == (B, S, d_model)
    assert jnp.allclose(out_gather, ref, atol=1e-5, rtol=1e-5), "gather path mismatch"

    print("KERNEL_OK")
</pallas_src>

<mosaic_0001>
module attributes {stable_mosaic.version = 11 : i64} {
  func.func @_onehot_embed_kernel(%arg0: i32, %arg1: memref<16x1xi32, #tpu.memory_space<vmem>>, %arg2: memref<64x128xf32, #tpu.memory_space<vmem>>, %arg3: memref<16x128xf32, #tpu.memory_space<vmem>>) attributes {dimension_semantics = [#tpu.dimension_semantics<parallel>], iteration_bounds = array<i64: 1>, scalar_prefetch = 0 : i64, scratch_operands = 0 : i64, tpu.core_type = #tpu.core_type<tc>, window_params = [{transform_indices = @transform_0, window_bounds = array<i64: 16, 1>}, {pipeline_mode = #tpu.pipeline_mode<synchronous>, transform_indices = @transform_1, window_bounds = array<i64: 64, 128>}, {transform_indices = @transform_2, window_bounds = array<i64: 16, 128>}]} {
    %c0 = arith.constant 0 : index
    %c0_0 = arith.constant 0 : index
    %0 = vector.load %arg1[%c0, %c0_0] : memref<16x1xi32, #tpu.memory_space<vmem>>, vector<16x1xi32>
    %1 = tpu.iota {dimensions = array<i32: 1>} : vector<16x64xi32>
    %2 = vector.broadcast %0 : vector<16x1xi32> to vector<16x64xi32>
    %3 = arith.cmpi eq, %2, %1 : vector<16x64xi32>
    %4 = arith.extui %3 : vector<16x64xi1> to vector<16x64xi32>
    %5 = arith.sitofp %4 : vector<16x64xi32> to vector<16x64xf32>
    %c0_1 = arith.constant 0 : index
    %c0_2 = arith.constant 0 : index
    %6 = vector.load %arg2[%c0_1, %c0_2] : memref<64x128xf32, #tpu.memory_space<vmem>>, vector<64x128xf32>
    %cst = arith.constant dense<0.000000e+00> : vector<16x128xf32>
    %7 = tpu.matmul %5, %6, %cst {dimension_numbers = #tpu.dot_dimension_numbers<[1], [0], [0], [1], [0, 0, 1, 1], [], []>} : vector<16x64xf32>, vector<64x128xf32>, vector<16x128xf32> -> vector<16x128xf32>
    %cst_3 = arith.constant 11.3137083 : f32
    %8 = vector.broadcast %cst_3 : f32 to vector<16x128xf32>
    %9 = arith.mulf %7, %8 : vector<16x128xf32>
    %c0_4 = arith.constant 0 : index
    %c0_5 = arith.constant 0 : index
    %10 = vector.load %arg3[%c0_4, %c0_5] : memref<16x128xf32, #tpu.memory_space<vmem>>, vector<16x128xf32>
    tpu.vector_store %arg3[%c0_4, %c0_5], %9 {strides = array<i32>} : memref<16x128xf32, #tpu.memory_space<vmem>>, vector<16x128xf32>,
    return
  }
  func.func @transform_0(%arg0: i32) -> (i32, i32) {
    %c0_i32 = arith.constant 0 : i32
    %c0_i32_0 = arith.constant 0 : i32
    return %arg0, %c0_i32 : i32, i32
  }
  func.func @transform_1(%arg0: i32) -> (i32, i32) {
    %c0_i32 = arith.constant 0 : i32
    %c0_i32_0 = arith.constant 0 : i32
    %c0_i32_1 = arith.constant 0 : i32
    return %c0_i32, %c0_i32_0 : i32, i32
  }
  func.func @transform_2(%arg0: i32) -> (i32, i32) {
    %c0_i32 = arith.constant 0 : i32
    %c0_i32_0 = arith.constant 0 : i32
    return %arg0, %c0_i32 : i32, i32
  }
}

</mosaic_0001>

<bundles_post_ra>
// kernel: tpu_custom_call.1
= control target key start
LH: loop header
LB: loop body
LE: loop exit
PB: predicated region body
PF: predicated region fallthrough
CT: control target
= control target key end

     0   :  { %7 = vsyncpa [#allocation3], 0  ;;  %s314_s0 = inlined_call_operand.vmem [shape: s32[16,1], index: 0, kind: input, shape index: {}]   ;;  %s315_s1 = inlined_call_operand.hbm [shape: f32[64,128], index: 1, kind: input, shape index: {}]   ;;  %s316_s2 = inlined_call_operand.hbm [shape: f32[16,128], index: 2, kind: output, shape index: {}]  }
   0x1   :  { %8 = vsyncpa [#allocation4], 0  ;;  %s257_s9 = smov [#allocation2]   ;;  %s209_s13 = scalar_lea.hbm %s315_s1, 1024 }
   0x2   :  { %s16_s10 = sshll.u32 %s257_s9, 4  ;;  %p210_p0 = scmp.ne.s32.totalorder %s315_s1, %s209_s13  ;;  %s17_s10 = int_to_ptr.vmem [resolvable:$true] %s16_s10 }
   0x3   :  { %p213_p1 = scmp.lt.u32.totalorder %s209_s13, %s315_s1 }
   0x5   :  { %p215_p2 = pnand %p213_p1, %p210_p0 }
   0x7   :  { %218 = shalt.err (!%p215_p2)
}
   0x8   :  { %s219_s18 = scalar_lea.vmem %s17_s10, 1024  ;;  %p224_p4 = scmp.lt.s32.totalorder %s17_s10, %s17_s10 }
   0x9   :  { %p220_p3 = scmp.ne.s32.totalorder %s17_s10, %s219_s18  ;;  %p225_p5 = scmp.lt.s32.totalorder %s219_s18, %s219_s18 }
   0xb   :  { %p226_p6 = por %p225_p5, %p224_p4 }
   0xd   :  { %p227_p7 = pnand %p226_p6, %p220_p3 }
   0xf   :  { %230 = shalt.err (!%p227_p7)
}
  0x10   :  { %s258_s19 = smov 128   ;;  %s259_s20 = smov 8  }
  0x11   :  { %22 = dma.hbm_to_vmem [thread:$0]  %s315_s1, 1024, %s17_s10, [#allocation3], %s258_s19, %s258_s19, %s259_s20  }
  0x12   :  { %253 = dma.done.wait [#allocation3], 1024  }
  0x13   :  { %254 = vsyncadd [#allocation3], 4294966272  ;;  %v260_v0 = vmov 0   ;;  %v26_v1 = vld [vmem:[%s314_s0] sm:$0xff]  ;;  %v43_v3 = vld [vmem:[#allocation2 + $0x8] sm:$0xff]  ;;  %v28_v15 = vlaneseq  ;;  %vm50_vm0 = vcmask 523264  }
  0x14   :  { %208 = vset.pattern.permute.xlu0 %v260_v0  ;;  %v42_v2 = vld [vmem:[#allocation2] sm:$0xff]  ;;  %v44_v4 = vld [vmem:[#allocation2 + $0x10] sm:$0xff]  ;;  %v45_v5 = vld [vmem:[#allocation2 + $0x18] sm:$0xff]  ;;  %v261_v18 = vmov 0.0  }
  0x15   :  { %31 = vperm.xlu0 %208, %v26_v1   ;;  %v27_v6 = vld [vmem:[%s314_s0 + $0x8] sm:$0xff]  ;;  %v186_v7 = vpack.c.bf16 %v43_v3, %v42_v2  ;;  %v190_v8 = vpack.c.bf16 %v45_v5, %v44_v4  ;;  %v46_v9 = vld [vmem:[#allocation2 + $0x20] sm:$0xff]  ;;  %v48_v12 = vld [vmem:[#allocation2 + $0x30] sm:$0xff]  ;;  %v29_v16 = vand.u32 127, %v28_v15  ;;  %s262_s0 = smov [#allocation5]  }
  0x16   :  { %v47_v10 = vld [vmem:[#allocation2 + $0x28] sm:$0xff]  ;;  %v49_v13 = vld [vmem:[#allocation2 + $0x38] sm:$0xff]  ;;  %s141_s1 = sshll.u32 %s262_s0, 4  ;;  %s142_s1 = int_to_ptr.vmem [resolvable:$true] %s141_s1 }
  0x17   :  { %187 = vmatprep.subr.bf16.mxu0 %v186_v7  ;;  %v194_v11 = vpack.c.bf16 %v47_v10, %v46_v9  ;;  %v198_v14 = vpack.c.bf16 %v49_v13, %v48_v12  ;;  %s231_s27 = scalar_lea.vmem %s142_s1, 256  ;;  %p236_p9 = scmp.lt.s32.totalorder %s142_s1, %s142_s1 }
  0x18   :  { %189 = vmatpush3.bf16.msra.mxu0 %v186_v7  ;;  %p232_p8 = scmp.ne.s32.totalorder %s142_s1, %s231_s27  ;;  %p237_p10 = scmp.lt.s32.totalorder %s231_s27, %s231_s27 }
  0x19   :  { %34 = vperm.xlu0 %208, %v27_v6   ;;  %191 = vmatprep.subr.bf16.mxu0 %v190_v8 }
  0x1a   :  { %p238_p11 = por %p237_p10, %p236_p9 }
  0x1c   :  { %193 = vmatpush3.bf16.msra.mxu0 %v190_v8  ;;  %p239_p12 = pnand %p238_p11, %p232_p8 }
  0x1d   :  { %195 = vmatprep.subr.bf16.mxu0 %v194_v11 }
  0x20   :  { %197 = vmatpush3.bf16.msra.mxu0 %v194_v11 }
  0x21   :  { %199 = vmatprep.subr.bf16.mxu0 %v198_v14 }
  0x24   :  { %201 = vmatpush3.bf16.msra.mxu0 %v198_v14 }
  0x94   :  { %v32_v17 = vpop.permute.xlu0 %31 }
  0x95   :  { %vm36_vm1 = vcmp.eq.s32.totalorder %v32_v17, %v29_v16 }
  0x96   :  { %v153_v19 = vsel %vm36_vm1, 1.0, %v261_v18 }
  0x97   :  { %183 = vmatprep.mubr.msk.f32.mxu0 %vm50_vm0, %v153_v19 }
  0x98   :  { %v35_v20 = vpop.permute.xlu0 %34 }
  0x99   :  { %vm37_vm2 = vcmp.eq.s32.totalorder %v35_v20, %v29_v16 }
  0x9a   :  { %v154_v21 = vsel %vm37_vm2, 1.0, %v261_v18 }
  0x9b   :  { %184 = vmatmul.mubr.msk.f32.vlgmr.msra.gmra.mrb[0].mxu0 %vm50_vm0, %v154_v21 }
 0x16e   :  { %v185_v22 = vpop.f32.mrb[0].mxu0 }
 0x16f   :  { %v133_v23 = vmul.f32 11.313708, %v185_v22  ;;  %v123_v24 = vpop.f32.mrb[1].mxu0 }
 0x170   :  { %v132_v25 = vmul.f32 11.313708, %v123_v24 }
 0x171   :  { %135 = vst [vmem:[#allocation5 + $0x8] sm:$0xff] %v133_v23 }
 0x172   :  { %134 = vst [vmem:[#allocation5] sm:$0xff] %v132_v25 }
 0x173   :  { %242 = shalt.err (!%p239_p12)
}
 0x174   :  { %s243_s30 = scalar_lea.hbm %s316_s2, 256 }
 0x175   :  { %p244_p13 = scmp.ne.s32.totalorder %s316_s2, %s243_s30  ;;  %p247_p0 = scmp.lt.u32.totalorder %s243_s30, %s316_s2 }
 0x177   :  { %p249_p1 = pnand %p247_p0, %p244_p13 }
 0x179   :  { %252 = shalt.err (!%p249_p1)
}
 0x17a   :  { %147 = dma.vmem_to_hbm [thread:$0]  %s142_s1, 256, %s316_s2, [#allocation4], %s258_s19, %s258_s19, %s259_s20  }
 0x17b   :  { %255 = dma.done.wait [#allocation4], 256  }
 0x17c   :  { %256 = vsyncadd [#allocation4], 4294967040 }
 0x17d   :  { %151 = vsyncpa [#allocation3], 1 }
 0x17e   :  { %152 = vsyncpa [#allocation4], 1 }

</bundles_post_ra>
